<compile_context>
chip_gen: v5e
topology: v5e:2x2
jax: 0.10.0
libtpu: 0.0.40
codegen_flags: <defaults>
</compile_context>

<pallas_src>
import functools

import jax
import jax.numpy as jnp
from jax import lax
from jax.experimental import pallas as pl
from jax.experimental.pallas import tpu as pltpu


def _attention_kernel(xq_ref, xkv_ref, wq_ref, wk_ref, wv_ref, wo_ref, o_ref, *, heads):
    xq = xq_ref[0]      # (TQ, D)  query tile
    xkv = xkv_ref[0]    # (N,  D)  full sequence for K/V
    cdtype = xq.dtype   # MXU operand dtype (bf16 inputs -> bf16 matmuls, f32 accum)

    # Contract last dim of both operands == x @ W.T with no transpose op.
    last_last = (((1,), (1,)), ((), ()))

    tq = xq.shape[0]
    d_model = o_ref.shape[-1]
    acc = jnp.zeros((tq, d_model), dtype=jnp.float32)

    # Static unrolled loop over a small head count. Each head's weights are a
    # leading-dim tile of the head-major weight arrays, so no activation
    # lane-slicing or concat is required.
    for h in range(heads):
        wq = wq_ref[h]   # (dh, D), scale already folded in
        wk = wk_ref[h]   # (dh, D)
        wv = wv_ref[h]   # (dh, D)
        wo = wo_ref[h]   # (D, dh)

        q = lax.dot_general(xq, wq, last_last, preferred_element_type=jnp.float32)   # (TQ, dh)
        k = lax.dot_general(xkv, wk, last_last, preferred_element_type=jnp.float32)  # (N, dh)
        v = lax.dot_general(xkv, wv, last_last, preferred_element_type=jnp.float32)  # (N, dh)

        # Scores: contract dh (last dims) -> (TQ, N); scale is baked into Wq.
        dots = lax.dot_general(q.astype(cdtype), k.astype(cdtype), last_last,
                               preferred_element_type=jnp.float32)

        # Softmax in f32; normalization via EUP approximate reciprocal.
        dots = dots - jnp.max(dots, axis=-1, keepdims=True)
        p = jnp.exp(dots)
        attn = p * pl.reciprocal(jnp.sum(p, axis=-1, keepdims=True), approx=True)

        # attn @ V -> (TQ, dh)
        ov = jnp.dot(attn.astype(cdtype), v.astype(cdtype),
                     preferred_element_type=jnp.float32)

        # Per-head output projection accumulated (replaces the old concat):
        # (TQ, dh) x (D, dh) contracting dh -> (TQ, D)
        acc = acc + lax.dot_general(ov.astype(cdtype), wo, last_last,
                                    preferred_element_type=jnp.float32)

    o_ref[0] = acc.astype(o_ref.dtype)


def attention_forward(x, w_qk, w_v, w_out, *, heads, dim_head, attn_mult=1.0, q_tile=128):
    """x: (B, N, D); w_qk: (2*inner, D); w_v: (inner, D); w_out: (D, inner)."""
    B, N, D = x.shape
    inner = heads * dim_head
    assert w_qk.shape == (2 * inner, D)
    assert w_v.shape == (inner, D)
    assert w_out.shape == (D, inner)
    scale = attn_mult * dim_head ** (-0.5)

    # One-time (wrapper-side) weight re-layouts:
    #   * split qk into head-major (H, dh, D) tiles; fold the softmax scale into Wq
    #   * output projection as (H, D, dh) so each head contributes via a
    #     contract-on-last-dim matmul that is summed in the kernel.
    wq_h = (w_qk[:inner] * scale).reshape(heads, dim_head, D)
    wk_h = w_qk[inner:].reshape(heads, dim_head, D)
    wv_h = w_v.reshape(heads, dim_head, D)
    wo_h = jnp.transpose(w_out.reshape(D, heads, dim_head), (1, 0, 2))   # (H, D, dh)

    # Query tiling for pipelining / megacore sharding; fall back to a full-N
    # block when N is small or not divisible by the tile.
    if N > q_tile and N % q_tile == 0:
        tq = q_tile
    else:
        tq = N
    grid = (B, N // tq)

    kernel = functools.partial(_attention_kernel, heads=heads)

    return pl.pallas_call(
        kernel,
        out_shape=jax.ShapeDtypeStruct((B, N, D), x.dtype),
        grid_spec=pltpu.PrefetchScalarGridSpec(
            num_scalar_prefetch=0,
            grid=grid,
            in_specs=[
                pl.BlockSpec((1, tq, D), lambda b, qi: (b, qi, 0)),            # x (query tile)
                pl.BlockSpec((1, N, D), lambda b, qi: (b, 0, 0)),              # x (full seq, K/V)
                pl.BlockSpec((heads, dim_head, D), lambda b, qi: (0, 0, 0)),   # Wq (scaled), head-major
                pl.BlockSpec((heads, dim_head, D), lambda b, qi: (0, 0, 0)),   # Wk, head-major
                pl.BlockSpec((heads, dim_head, D), lambda b, qi: (0, 0, 0)),   # Wv, head-major
                pl.BlockSpec((heads, D, dim_head), lambda b, qi: (0, 0, 0)),   # Wo, head-major
            ],
            out_specs=pl.BlockSpec((1, tq, D), lambda b, qi: (b, qi, 0)),
        ),
        compiler_params=pltpu.CompilerParams(
            dimension_semantics=("parallel", "parallel"),
            vmem_limit_bytes=64 * 1024 * 1024,   # above v5e's 16 MiB scoped default
        ),
    )(x, x, wq_h, wk_h, wv_h, wo_h)


def attention_reference(x, w_qk, w_v, w_out, *, heads, dim_head, attn_mult=1.0):
    """Plain-JAX reference matching the PyTorch forward exactly."""
    B, N, D = x.shape
    inner = heads * dim_head
    scale = attn_mult * dim_head ** (-0.5)

    qk = jnp.einsum('bnd,ed->bne', x, w_qk)              # (B, N, 2*inner)
    q, k = qk[..., :inner], qk[..., inner:]
    v = jnp.einsum('bnd,ed->bne', x, w_v)                # (B, N, inner)

    def split_heads(t):
        return t.reshape(B, N, heads, dim_head).transpose(0, 2, 1, 3)  # (B, H, N, dh)

    q, k, v = map(split_heads, (q, k, v))
    dots = jnp.einsum('bhnd,bhmd->bhnm', q, k) * scale
    attn = jax.nn.softmax(dots, axis=-1)
    out = jnp.einsum('bhnm,bhmd->bhnd', attn, v)
    out = out.transpose(0, 2, 1, 3).reshape(B, N, inner)
    return jnp.einsum('bne,de->bnd', out, w_out)


if __name__ == "__main__":
    # Small, forward-consistent shapes.
    B, N, D = 2, 8, 32
    HEADS, DIM_HEAD = 4, 16
    INNER = HEADS * DIM_HEAD

    key = jax.random.PRNGKey(0)
    kx, kqk, kv, ko = jax.random.split(key, 4)

    x = jax.random.normal(kx, (B, N, D), dtype=jnp.float32)
    # Deterministic "nn.Linear"-style weights (out_features, in_features), no bias.
    w_qk = jax.random.normal(kqk, (2 * INNER, D), dtype=jnp.float32) * (1.0 / D ** 0.5)
    w_v = jax.random.normal(kv, (INNER, D), dtype=jnp.float32) * (1.0 / D ** 0.5)
    w_out = jax.random.normal(ko, (D, INNER), dtype=jnp.float32) * (1.0 / INNER ** 0.5)

    out = attention_forward(x, w_qk, w_v, w_out, heads=HEADS, dim_head=DIM_HEAD)
    out = jax.block_until_ready(out)

    ref = attention_reference(x, w_qk, w_v, w_out, heads=HEADS, dim_head=DIM_HEAD)
    assert out.shape == (B, N, D)
    # Tolerance accounts for the EUP approximate-reciprocal softmax normalization
    # (structural errors would be O(1), far above this).
    assert jnp.allclose(out, ref, atol=2e-2, rtol=2e-2), "mismatch vs reference"

    print("KERNEL_OK")
</pallas_src>

<mosaic_0001>
module attributes {stable_mosaic.version = 11 : i64} {
  func.func @_attention_kernel(%arg0: i32, %arg1: i32, %arg2: memref<1x8x32xf32, #tpu.memory_space<vmem>>, %arg3: memref<1x8x32xf32, #tpu.memory_space<vmem>>, %arg4: memref<4x16x32xf32, #tpu.memory_space<vmem>>, %arg5: memref<4x16x32xf32, #tpu.memory_space<vmem>>, %arg6: memref<4x16x32xf32, #tpu.memory_space<vmem>>, %arg7: memref<4x32x16xf32, #tpu.memory_space<vmem>>, %arg8: memref<1x8x32xf32, #tpu.memory_space<vmem>>) attributes {dimension_semantics = [#tpu.dimension_semantics<parallel>, #tpu.dimension_semantics<parallel>], iteration_bounds = array<i64: 2, 1>, scalar_prefetch = 0 : i64, scratch_operands = 0 : i64, tpu.core_type = #tpu.core_type<tc>, window_params = [{transform_indices = @transform_0, window_bounds = array<i64: 1, 8, 32>}, {transform_indices = @transform_1, window_bounds = array<i64: 1, 8, 32>}, {pipeline_mode = #tpu.pipeline_mode<synchronous>, transform_indices = @transform_2, window_bounds = array<i64: 4, 16, 32>}, {pipeline_mode = #tpu.pipeline_mode<synchronous>, transform_indices = @transform_3, window_bounds = array<i64: 4, 16, 32>}, {pipeline_mode = #tpu.pipeline_mode<synchronous>, transform_indices = @transform_4, window_bounds = array<i64: 4, 16, 32>}, {pipeline_mode = #tpu.pipeline_mode<synchronous>, transform_indices = @transform_5, window_bounds = array<i64: 4, 32, 16>}, {transform_indices = @transform_6, window_bounds = array<i64: 1, 8, 32>}]} {
    %c0 = arith.constant 0 : index
    %c0_0 = arith.constant 0 : index
    %c0_1 = arith.constant 0 : index
    %0 = vector.load %arg2[%c0, %c0_0, %c0_1] : memref<1x8x32xf32, #tpu.memory_space<vmem>>, vector<1x8x32xf32>
    %1 = vector.shape_cast %0 : vector<1x8x32xf32> to vector<8x32xf32>
    %c0_2 = arith.constant 0 : index
    %c0_3 = arith.constant 0 : index
    %c0_4 = arith.constant 0 : index
    %2 = vector.load %arg3[%c0_2, %c0_3, %c0_4] : memref<1x8x32xf32, #tpu.memory_space<vmem>>, vector<1x8x32xf32>
    %3 = vector.shape_cast %2 : vector<1x8x32xf32> to vector<8x32xf32>
    %cst = arith.constant 0.000000e+00 : f32
    %4 = vector.broadcast %cst : f32 to vector<8x32xf32>
    %c0_5 = arith.constant 0 : index
    %c0_6 = arith.constant 0 : index
    %c0_7 = arith.constant 0 : index
    %5 = vector.load %arg4[%c0_5, %c0_6, %c0_7] : memref<4x16x32xf32, #tpu.memory_space<vmem>>, vector<1x16x32xf32>
    %6 = vector.shape_cast %5 : vector<1x16x32xf32> to vector<16x32xf32>
    %c0_8 = arith.constant 0 : index
    %c0_9 = arith.constant 0 : index
    %c0_10 = arith.constant 0 : index
    %7 = vector.load %arg5[%c0_8, %c0_9, %c0_10] : memref<4x16x32xf32, #tpu.memory_space<vmem>>, vector<1x16x32xf32>
    %8 = vector.shape_cast %7 : vector<1x16x32xf32> to vector<16x32xf32>
    %c0_11 = arith.constant 0 : index
    %c0_12 = arith.constant 0 : index
    %c0_13 = arith.constant 0 : index
    %9 = vector.load %arg6[%c0_11, %c0_12, %c0_13] : memref<4x16x32xf32, #tpu.memory_space<vmem>>, vector<1x16x32xf32>
    %10 = vector.shape_cast %9 : vector<1x16x32xf32> to vector<16x32xf32>
    %c0_14 = arith.constant 0 : index
    %c0_15 = arith.constant 0 : index
    %c0_16 = arith.constant 0 : index
    %11 = vector.load %arg7[%c0_14, %c0_15, %c0_16] : memref<4x32x16xf32, #tpu.memory_space<vmem>>, vector<1x32x16xf32>
    %12 = vector.shape_cast %11 : vector<1x32x16xf32> to vector<32x16xf32>
    %cst_17 = arith.constant dense<0.000000e+00> : vector<8x16xf32>
    %13 = tpu.matmul %1, %6, %cst_17 {dimension_numbers = #tpu.dot_dimension_numbers<[1], [1], [0], [0], [0, 0, 1, 0], [], []>} : vector<8x32xf32>, vector<16x32xf32>, vector<8x16xf32> -> vector<8x16xf32>
    %cst_18 = arith.constant dense<0.000000e+00> : vector<8x16xf32>
    %14 = tpu.matmul %3, %8, %cst_18 {dimension_numbers = #tpu.dot_dimension_numbers<[1], [1], [0], [0], [0, 0, 1, 0], [], []>} : vector<8x32xf32>, vector<16x32xf32>, vector<8x16xf32> -> vector<8x16xf32>
    %cst_19 = arith.constant dense<0.000000e+00> : vector<8x16xf32>
    %15 = tpu.matmul %3, %10, %cst_19 {dimension_numbers = #tpu.dot_dimension_numbers<[1], [1], [0], [0], [0, 0, 1, 0], [], []>} : vector<8x32xf32>, vector<16x32xf32>, vector<8x16xf32> -> vector<8x16xf32>
    %cst_20 = arith.constant dense<0.000000e+00> : vector<8x8xf32>
    %16 = tpu.matmul %13, %14, %cst_20 {dimension_numbers = #tpu.dot_dimension_numbers<[1], [1], [0], [0], [0, 0, 1, 0], [], []>} : vector<8x16xf32>, vector<8x16xf32>, vector<8x8xf32> -> vector<8x8xf32>
    %cst_21 = arith.constant dense<0xFF800000> : vector<8xf32>
    %17 = vector.multi_reduction <maximumf>, %16, %cst_21 [1] : vector<8x8xf32> to vector<8xf32>
    %18 = vector.shape_cast %17 : vector<8xf32> to vector<8x1xf32>
    %19 = vector.broadcast %18 : vector<8x1xf32> to vector<8x8xf32>
    %20 = arith.subf %16, %19 : vector<8x8xf32>
    %21 = math.exp %20 : vector<8x8xf32>
    %cst_22 = arith.constant dense<0.000000e+00> : vector<8xf32>
    %22 = vector.multi_reduction <add>, %21, %cst_22 [1] : vector<8x8xf32> to vector<8xf32>
    %23 = vector.shape_cast %22 : vector<8xf32> to vector<8x1xf32>
    %24 = tpu.reciprocal %23 {approx = true} : vector<8x1xf32> -> vector<8x1xf32>
    %25 = vector.broadcast %24 : vector<8x1xf32> to vector<8x8xf32>
    %26 = arith.mulf %21, %25 : vector<8x8xf32>
    %cst_23 = arith.constant dense<0.000000e+00> : vector<8x16xf32>
    %27 = tpu.matmul %26, %15, %cst_23 {dimension_numbers = #tpu.dot_dimension_numbers<[1], [0], [0], [1], [0, 0, 1, 1], [], []>} : vector<8x8xf32>, vector<8x16xf32>, vector<8x16xf32> -> vector<8x16xf32>
    %cst_24 = arith.constant dense<0.000000e+00> : vector<8x32xf32>
    %28 = tpu.matmul %27, %12, %cst_24 {dimension_numbers = #tpu.dot_dimension_numbers<[1], [1], [0], [0], [0, 0, 1, 0], [], []>} : vector<8x16xf32>, vector<32x16xf32>, vector<8x32xf32> -> vector<8x32xf32>
    %29 = arith.addf %4, %28 : vector<8x32xf32>
    %c1 = arith.constant 1 : index
    %c0_25 = arith.constant 0 : index
    %c0_26 = arith.constant 0 : index
    %30 = vector.load %arg4[%c1, %c0_25, %c0_26] : memref<4x16x32xf32, #tpu.memory_space<vmem>>, vector<1x16x32xf32>
    %31 = vector.shape_cast %30 : vector<1x16x32xf32> to vector<16x32xf32>
    %c1_27 = arith.constant 1 : index
    %c0_28 = arith.constant 0 : index
    %c0_29 = arith.constant 0 : index
    %32 = vector.load %arg5[%c1_27, %c0_28, %c0_29] : memref<4x16x32xf32, #tpu.memory_space<vmem>>, vector<1x16x32xf32>
    %33 = vector.shape_cast %32 : vector<1x16x32xf32> to vector<16x32xf32>
    %c1_30 = arith.constant 1 : index
    %c0_31 = arith.constant 0 : index
    %c0_32 = arith.constant 0 : index
    %34 = vector.load %arg6[%c1_30, %c0_31, %c0_32] : memref<4x16x32xf32, #tpu.memory_space<vmem>>, vector<1x16x32xf32>
    %35 = vector.shape_cast %34 : vector<1x16x32xf32> to vector<16x32xf32>
    %c1_33 = arith.constant 1 : index
    %c0_34 = arith.constant 0 : index
    %c0_35 = arith.constant 0 : index
    %36 = vector.load %arg7[%c1_33, %c0_34, %c0_35] : memref<4x32x16xf32, #tpu.memory_space<vmem>>, vector<1x32x16xf32>
    %37 = vector.shape_cast %36 : vector<1x32x16xf32> to vector<32x16xf32>
    %cst_36 = arith.constant dense<0.000000e+00> : vector<8x16xf32>
    %38 = tpu.matmul %1, %31, %cst_36 {dimension_numbers = #tpu.dot_dimension_numbers<[1], [1], [0], [0], [0, 0, 1, 0], [], []>} : vector<8x32xf32>, vector<16x32xf32>, vector<8x16xf32> -> vector<8x16xf32>
    %cst_37 = arith.constant dense<0.000000e+00> : vector<8x16xf32>
    %39 = tpu.matmul %3, %33, %cst_37 {dimension_numbers = #tpu.dot_dimension_numbers<[1], [1], [0], [0], [0, 0, 1, 0], [], []>} : vector<8x32xf32>, vector<16x32xf32>, vector<8x16xf32> -> vector<8x16xf32>
    %cst_38 = arith.constant dense<0.000000e+00> : vector<8x16xf32>
    %40 = tpu.matmul %3, %35, %cst_38 {dimension_numbers = #tpu.dot_dimension_numbers<[1], [1], [0], [0], [0, 0, 1, 0], [], []>} : vector<8x32xf32>, vector<16x32xf32>, vector<8x16xf32> -> vector<8x16xf32>
    %cst_39 = arith.constant dense<0.000000e+00> : vector<8x8xf32>
    %41 = tpu.matmul %38, %39, %cst_39 {dimension_numbers = #tpu.dot_dimension_numbers<[1], [1], [0], [0], [0, 0, 1, 0], [], []>} : vector<8x16xf32>, vector<8x16xf32>, vector<8x8xf32> -> vector<8x8xf32>
    %cst_40 = arith.constant dense<0xFF800000> : vector<8xf32>
    %42 = vector.multi_reduction <maximumf>, %41, %cst_40 [1] : vector<8x8xf32> to vector<8xf32>
    %43 = vector.shape_cast %42 : vector<8xf32> to vector<8x1xf32>
    %44 = vector.broadcast %43 : vector<8x1xf32> to vector<8x8xf32>
    %45 = arith.subf %41, %44 : vector<8x8xf32>
    %46 = math.exp %45 : vector<8x8xf32>
    %cst_41 = arith.constant dense<0.000000e+00> : vector<8xf32>
    %47 = vector.multi_reduction <add>, %46, %cst_41 [1] : vector<8x8xf32> to vector<8xf32>
    %48 = vector.shape_cast %47 : vector<8xf32> to vector<8x1xf32>
    %49 = tpu.reciprocal %48 {approx = true} : vector<8x1xf32> -> vector<8x1xf32>
    %50 = vector.broadcast %49 : vector<8x1xf32> to vector<8x8xf32>
    %51 = arith.mulf %46, %50 : vector<8x8xf32>
    %cst_42 = arith.constant dense<0.000000e+00> : vector<8x16xf32>
    %52 = tpu.matmul %51, %40, %cst_42 {dimension_numbers = #tpu.dot_dimension_numbers<[1], [0], [0], [1], [0, 0, 1, 1], [], []>} : vector<8x8xf32>, vector<8x16xf32>, vector<8x16xf32> -> vector<8x16xf32>
    %cst_43 = arith.constant dense<0.000000e+00> : vector<8x32xf32>
    %53 = tpu.matmul %52, %37, %cst_43 {dimension_numbers = #tpu.dot_dimension_numbers<[1], [1], [0], [0], [0, 0, 1, 0], [], []>} : vector<8x16xf32>, vector<32x16xf32>, vector<8x32xf32> -> vector<8x32xf32>
    %54 = arith.addf %29, %53 : vector<8x32xf32>
    %c2 = arith.constant 2 : index
    %c0_44 = arith.constant 0 : index
    %c0_45 = arith.constant 0 : index
    %55 = vector.load %arg4[%c2, %c0_44, %c0_45] : memref<4x16x32xf32, #tpu.memory_space<vmem>>, vector<1x16x32xf32>
    %56 = vector.shape_cast %55 : vector<1x16x32xf32> to vector<16x32xf32>
    %c2_46 = arith.constant 2 : index
    %c0_47 = arith.constant 0 : index
    %c0_48 = arith.constant 0 : index
    %57 = vector.load %arg5[%c2_46, %c0_47, %c0_48] : memref<4x16x32xf32, #tpu.memory_space<vmem>>, vector<1x16x32xf32>
    %58 = vector.shape_cast %57 : vector<1x16x32xf32> to vector<16x32xf32>
    %c2_49 = arith.constant 2 : index
    %c0_50 = arith.constant 0 : index
    %c0_51 = arith.constant 0 : index
    %59 = vector.load %arg6[%c2_49, %c0_50, %c0_51] : memref<4x16x32xf32, #tpu.memory_space<vmem>>, vector<1x16x32xf32>
    %60 = vector.shape_cast %59 : vector<1x16x32xf32> to vector<16x32xf32>
    %c2_52 = arith.constant 2 : index
    %c0_53 = arith.constant 0 : index
    %c0_54 = arith.constant 0 : index
    %61 = vector.load %arg7[%c2_52, %c0_53, %c0_54] : memref<4x32x16xf32, #tpu.memory_space<vmem>>, vector<1x32x16xf32>
    %62 = vector.shape_cast %61 : vector<1x32x16xf32> to vector<32x16xf32>
    %cst_55 = arith.constant dense<0.000000e+00> : vector<8x16xf32>
    %63 = tpu.matmul %1, %56, %cst_55 {dimension_numbers = #tpu.dot_dimension_numbers<[1], [1], [0], [0], [0, 0, 1, 0], [], []>} : vector<8x32xf32>, vector<16x32xf32>, vector<8x16xf32> -> vector<8x16xf32>
    %cst_56 = arith.constant dense<0.000000e+00> : vector<8x16xf32>
    %64 = tpu.matmul %3, %58, %cst_56 {dimension_numbers = #tpu.dot_dimension_numbers<[1], [1], [0], [0], [0, 0, 1, 0], [], []>} : vector<8x32xf32>, vector<16x32xf32>, vector<8x16xf32> -> vector<8x16xf32>
    %cst_57 = arith.constant dense<0.000000e+00> : vector<8x16xf32>
    %65 = tpu.matmul %3, %60, %cst_57 {dimension_numbers = #tpu.dot_dimension_numbers<[1], [1], [0], [0], [0, 0, 1, 0], [], []>} : vector<8x32xf32>, vector<16x32xf32>, vector<8x16xf32> -> vector<8x16xf32>
    %cst_58 = arith.constant dense<0.000000e+00> : vector<8x8xf32>
    %66 = tpu.matmul %63, %64, %cst_58 {dimension_numbers = #tpu.dot_dimension_numbers<[1], [1], [0], [0], [0, 0, 1, 0], [], []>} : vector<8x16xf32>, vector<8x16xf32>, vector<8x8xf32> -> vector<8x8xf32>
    %cst_59 = arith.constant dense<0xFF800000> : vector<8xf32>
    %67 = vector.multi_reduction <maximumf>, %66, %cst_59 [1] : vector<8x8xf32> to vector<8xf32>
    %68 = vector.shape_cast %67 : vector<8xf32> to vector<8x1xf32>
    %69 = vector.broadcast %68 : vector<8x1xf32> to vector<8x8xf32>
    %70 = arith.subf %66, %69 : vector<8x8xf32>
    %71 = math.exp %70 : vector<8x8xf32>
    %cst_60 = arith.constant dense<0.000000e+00> : vector<8xf32>
    %72 = vector.multi_reduction <add>, %71, %cst_60 [1] : vector<8x8xf32> to vector<8xf32>
    %73 = vector.shape_cast %72 : vector<8xf32> to vector<8x1xf32>
    %74 = tpu.reciprocal %73 {approx = true} : vector<8x1xf32> -> vector<8x1xf32>
    %75 = vector.broadcast %74 : vector<8x1xf32> to vector<8x8xf32>
    %76 = arith.mulf %71, %75 : vector<8x8xf32>
    %cst_61 = arith.constant dense<0.000000e+00> : vector<8x16xf32>
    %77 = tpu.matmul %76, %65, %cst_61 {dimension_numbers = #tpu.dot_dimension_numbers<[1], [0], [0], [1], [0, 0, 1, 1], [], []>} : vector<8x8xf32>, vector<8x16xf32>, vector<8x16xf32> -> vector<8x16xf32>
    %cst_62 = arith.constant dense<0.000000e+00> : vector<8x32xf32>
    %78 = tpu.matmul %77, %62, %cst_62 {dimension_numbers = #tpu.dot_dimension_numbers<[1], [1], [0], [0], [0, 0, 1, 0], [], []>} : vector<8x16xf32>, vector<32x16xf32>, vector<8x32xf32> -> vector<8x32xf32>
    %79 = arith.addf %54, %78 : vector<8x32xf32>
    %c3 = arith.constant 3 : index
    %c0_63 = arith.constant 0 : index
    %c0_64 = arith.constant 0 : index
    %80 = vector.load %arg4[%c3, %c0_63, %c0_64] : memref<4x16x32xf32, #tpu.memory_space<vmem>>, vector<1x16x32xf32>
    %81 = vector.shape_cast %80 : vector<1x16x32xf32> to vector<16x32xf32>
    %c3_65 = arith.constant 3 : index
    %c0_66 = arith.constant 0 : index
    %c0_67 = arith.constant 0 : index
    %82 = vector.load %arg5[%c3_65, %c0_66, %c0_67] : memref<4x16x32xf32, #tpu.memory_space<vmem>>, vector<1x16x32xf32>
    %83 = vector.shape_cast %82 : vector<1x16x32xf32> to vector<16x32xf32>
    %c3_68 = arith.constant 3 : index
    %c0_69 = arith.constant 0 : index
    %c0_70 = arith.constant 0 : index
    %84 = vector.load %arg6[%c3_68, %c0_69, %c0_70] : memref<4x16x32xf32, #tpu.memory_space<vmem>>, vector<1x16x32xf32>
    %85 = vector.shape_cast %84 : vector<1x16x32xf32> to vector<16x32xf32>
    %c3_71 = arith.constant 3 : index
    %c0_72 = arith.constant 0 : index
    %c0_73 = arith.constant 0 : index
    %86 = vector.load %arg7[%c3_71, %c0_72, %c0_73] : memref<4x32x16xf32, #tpu.memory_space<vmem>>, vector<1x32x16xf32>
    %87 = vector.shape_cast %86 : vector<1x32x16xf32> to vector<32x16xf32>
    %cst_74 = arith.constant dense<0.000000e+00> : vector<8x16xf32>
    %88 = tpu.matmul %1, %81, %cst_74 {dimension_numbers = #tpu.dot_dimension_numbers<[1], [1], [0], [0], [0, 0, 1, 0], [], []>} : vector<8x32xf32>, vector<16x32xf32>, vector<8x16xf32> -> vector<8x16xf32>
    %cst_75 = arith.constant dense<0.000000e+00> : vector<8x16xf32>
    %89 = tpu.matmul %3, %83, %cst_75 {dimension_numbers = #tpu.dot_dimension_numbers<[1], [1], [0], [0], [0, 0, 1, 0], [], []>} : vector<8x32xf32>, vector<16x32xf32>, vector<8x16xf32> -> vector<8x16xf32>
    %cst_76 = arith.constant dense<0.000000e+00> : vector<8x16xf32>
    %90 = tpu.matmul %3, %85, %cst_76 {dimension_numbers = #tpu.dot_dimension_numbers<[1], [1], [0], [0], [0, 0, 1, 0], [], []>} : vector<8x32xf32>, vector<16x32xf32>, vector<8x16xf32> -> vector<8x16xf32>
    %cst_77 = arith.constant dense<0.000000e+00> : vector<8x8xf32>
    %91 = tpu.matmul %88, %89, %cst_77 {dimension_numbers = #tpu.dot_dimension_numbers<[1], [1], [0], [0], [0, 0, 1, 0], [], []>} : vector<8x16xf32>, vector<8x16xf32>, vector<8x8xf32> -> vector<8x8xf32>
    %cst_78 = arith.constant dense<0xFF800000> : vector<8xf32>
    %92 = vector.multi_reduction <maximumf>, %91, %cst_78 [1] : vector<8x8xf32> to vector<8xf32>
    %93 = vector.shape_cast %92 : vector<8xf32> to vector<8x1xf32>
    %94 = vector.broadcast %93 : vector<8x1xf32> to vector<8x8xf32>
    %95 = arith.subf %91, %94 : vector<8x8xf32>
    %96 = math.exp %95 : vector<8x8xf32>
    %cst_79 = arith.constant dense<0.000000e+00> : vector<8xf32>
    %97 = vector.multi_reduction <add>, %96, %cst_79 [1] : vector<8x8xf32> to vector<8xf32>
    %98 = vector.shape_cast %97 : vector<8xf32> to vector<8x1xf32>
    %99 = tpu.reciprocal %98 {approx = true} : vector<8x1xf32> -> vector<8x1xf32>
    %100 = vector.broadcast %99 : vector<8x1xf32> to vector<8x8xf32>
    %101 = arith.mulf %96, %100 : vector<8x8xf32>
    %cst_80 = arith.constant dense<0.000000e+00> : vector<8x16xf32>
    %102 = tpu.matmul %101, %90, %cst_80 {dimension_numbers = #tpu.dot_dimension_numbers<[1], [0], [0], [1], [0, 0, 1, 1], [], []>} : vector<8x8xf32>, vector<8x16xf32>, vector<8x16xf32> -> vector<8x16xf32>
    %cst_81 = arith.constant dense<0.000000e+00> : vector<8x32xf32>
    %103 = tpu.matmul %102, %87, %cst_81 {dimension_numbers = #tpu.dot_dimension_numbers<[1], [1], [0], [0], [0, 0, 1, 0], [], []>} : vector<8x16xf32>, vector<32x16xf32>, vector<8x32xf32> -> vector<8x32xf32>
    %104 = arith.addf %79, %103 : vector<8x32xf32>
    %c0_82 = arith.constant 0 : index
    %c0_83 = arith.constant 0 : index
    %c0_84 = arith.constant 0 : index
    %105 = vector.load %arg8[%c0_82, %c0_83, %c0_84] : memref<1x8x32xf32, #tpu.memory_space<vmem>>, vector<1x8x32xf32>
    %106 = vector.shape_cast %105 : vector<1x8x32xf32> to vector<8x32xf32>
    %107 = vector.shape_cast %104 : vector<8x32xf32> to vector<1x8x32xf32>
    tpu.vector_store %arg8[%c0_82, %c0_83, %c0_84], %107 {strides = array<i32>} : memref<1x8x32xf32, #tpu.memory_space<vmem>>, vector<1x8x32xf32>,
    return
  }
  func.func @transform_0(%arg0: i32, %arg1: i32) -> (i32, i32, i32) {
    %c0_i32 = arith.constant 0 : i32
    %c0_i32_0 = arith.constant 0 : i32
    return %arg0, %arg1, %c0_i32 : i32, i32, i32
  }
  func.func @transform_1(%arg0: i32, %arg1: i32) -> (i32, i32, i32) {
    %c0_i32 = arith.constant 0 : i32
    %c0_i32_0 = arith.constant 0 : i32
    %c0_i32_1 = arith.constant 0 : i32
    return %arg0, %c0_i32, %c0_i32_0 : i32, i32, i32
  }
  func.func @transform_2(%arg0: i32, %arg1: i32) -> (i32, i32, i32) {
    %c0_i32 = arith.constant 0 : i32
    %c0_i32_0 = arith.constant 0 : i32
    %c0_i32_1 = arith.constant 0 : i32
    %c0_i32_2 = arith.constant 0 : i32
    return %c0_i32, %c0_i32_0, %c0_i32_1 : i32, i32, i32
  }
  func.func @transform_3(%arg0: i32, %arg1: i32) -> (i32, i32, i32) {
    %c0_i32 = arith.constant 0 : i32
    %c0_i32_0 = arith.constant 0 : i32
    %c0_i32_1 = arith.constant 0 : i32
    %c0_i32_2 = arith.constant 0 : i32
    return %c0_i32, %c0_i32_0, %c0_i32_1 : i32, i32, i32
  }
  func.func @transform_4(%arg0: i32, %arg1: i32) -> (i32, i32, i32) {
    %c0_i32 = arith.constant 0 : i32
    %c0_i32_0 = arith.constant 0 : i32
    %c0_i32_1 = arith.constant 0 : i32
    %c0_i32_2 = arith.constant 0 : i32
    return %c0_i32, %c0_i32_0, %c0_i32_1 : i32, i32, i32
  }
  func.func @transform_5(%arg0: i32, %arg1: i32) -> (i32, i32, i32) {
    %c0_i32 = arith.constant 0 : i32
    %c0_i32_0 = arith.constant 0 : i32
    %c0_i32_1 = arith.constant 0 : i32
    %c0_i32_2 = arith.constant 0 : i32
    return %c0_i32, %c0_i32_0, %c0_i32_1 : i32, i32, i32
  }
  func.func @transform_6(%arg0: i32, %arg1: i32) -> (i32, i32, i32) {
    %c0_i32 = arith.constant 0 : i32
    %c0_i32_0 = arith.constant 0 : i32
    return %arg0, %arg1, %c0_i32 : i32, i32, i32
  }
}

</mosaic_0001>

<bundles_post_ra>
// kernel: tpu_custom_call.1
= control target key start
LH: loop header
LB: loop body
LE: loop exit
PB: predicated region body
PF: predicated region fallthrough
CT: control target
= control target key end

     0   :  { %11 = vsyncpa [#allocation3], 0  ;;  %s1929_s0 = inlined_call_operand.hbm [shape: f32[2,8,32], index: 0, kind: input, shape index: {}]   ;;  %s1930_s1 = inlined_call_operand.hbm [shape: f32[2,8,32], index: 1, kind: input, shape index: {}]   ;;  %s1931_s2 = inlined_call_operand.vmem [shape: f32[4,16,32], index: 2, kind: input, shape index: {}]   ;;  %s1932_s3 = inlined_call_operand.vmem [shape: f32[4,16,32], index: 3, kind: input, shape index: {}]   ;;  %s1933_s4 = inlined_call_operand.vmem [shape: f32[4,16,32], index: 4, kind: input, shape index: {}]   ;;  %s1934_s5 = inlined_call_operand.vmem [shape: f32[4,32,16], index: 5, kind: input, shape index: {}]   ;;  %s1935_s6 = inlined_call_operand.hbm [shape: f32[2,8,32], index: 6, kind: output, shape index: {}]  }
   0x1   :  { %13 = vsyncpa [#allocation3 + $0x1], 0 }
   0x2   :  { %14 = vsyncpa [#allocation6], 0 }
   0x3   :  { %16 = vsyncpa [#allocation6 + $0x1], 0 }
   0x4   :  { %17 = vsyncpa [#allocation4], 0 }
   0x5   :  { %19 = vsyncpa [#allocation4 + $0x1], 0  ;;  %s1583_s21 = smov 0   ;;  %s1585_s22 = smov 0  }
   0x6   :  { %s1587_s23 = smov 0   ;;  %s1589_s24 = smov 0  }
   0x7   :  { %s1591_s25 = smov 0   ;;  %s1593_s26 = smov 0  }
   0x8 LB: > { %1938 = sst [smem:[#allocation11_spill]] %s1542_s25  ;;  %s1203_s27 = sadd.s32 4294967295, %s1546_s26   ;;  %s1546_s26 = sphi %s1593_s26, %s25_s26   ;;  %s1542_s25 = sphi %s1591_s25, %s1947_s25   ;;  %s1538_s24 = sphi %s1589_s24, %s1946_s24   ;;  %s1534_s23 = sphi %s1587_s23, %s1950_s23   ;;  %s1530_s22 = sphi %s1585_s22, %s1949_s22   ;;  %s1526_s21 = sphi %s1583_s21, %s1948_s21  }
   0x9   : > { %s1204_s28 = sadd.s32 4294967294, %s1546_s26   ;;  %s37_s29 = sadd.s32 1, %s1542_s25 }
   0xa   : > { %s46_s30 = sadd.s32 1, %s1534_s23  ;;  %p39_p0 = scmp.ge.s32.totalorder %s37_s29, 2 }
   0xb   : > { %p53_p1 = scmp.ne.s32.totalorder %s1534_s23, %s1530_s22  ;;  %p54_p2 = scmp.eq.s32.totalorder %s1546_s26, 0 }
   0xc   : > { %p59_p3 = scmp.ne.s32.totalorder %s1530_s22, %s1526_s21  ;;  %s1952_s29 = smov (%p39_p0, %s37_s29), 0 }
   0xd   : > { %1939 = sst [smem:[#allocation12_spill]] %s1952_s29  ;;  %p1624_p4 = por %p54_p2, %p53_p1 }
   0xe   : > { %p60_p5 = scmp.eq.s32.totalorder %s1203_s27, 0  ;;  %s41_s8 = ssub.s32 %s1542_s25, %s1952_s29 }
   0xf   : > { %p195_p6 = scmp.eq.s32.totalorder %s1203_s27, 1  ;;  %p44_p7 = scmp.eq.s32.totalorder %s41_s8, 0 }
  0x10   : > { %p1630_p8 = por %p60_p5, %p59_p3  ;;  %p201_p10 = scmp.eq.s32.totalorder %s1204_s28, 1 }
  0x11   : > { %p1634_p9 = por %p195_p6, %p53_p1  ;;  %p1206_p12 = scmp.ge.s32.totalorder %s1546_s26, 2 }
  0x12   : > { %s1639_s11 = scalar_select %p44_p7, %s1534_s23, %s46_s30  }
  0x13   : > { %p1641_p11 = por %p201_p10, %p59_p3  ;;  %p1334_p13 = scmp.lt.s32.totalorder %s1546_s26, 2 }
  0x14   : > { %1943 = sst [smem:[#allocation13_spill]] %s1639_s11  ;;  %s233_s13 = sand.u32 1, %s1534_s23  }
  0x15   : > { %s1207_s14 = sshll.u32 %s233_s13, 3  ;;  %s1208_s15 = sshll.u32 %s1542_s25, 3 }
  0x16   : > { %s242_s18 = scalar_lea.hbm %s1929_s0, %s1208_s15  ;;  %s237_s19 = scalar_lea.vmem [#allocation2], %s1207_s14 }
  0x17   : > { %s246_s20 = sshll.u32 %s237_s19, 4  ;;  %s244_s27 = sshll.u32 %s242_s18, 4  ;;  %s247_s20 = int_to_ptr.vmem [resolvable:$true] %s246_s20  ;;  %s245_s27 = int_to_ptr.hbm [resolvable:$true] %s244_s27 }
  0x18   : > { %p1324_p0 = pnand %p1334_p13, %p1624_p4  ;;  %p1211_p1 = scmp.ge.s32.totalorder %s1546_s26, 1 }
  0x19   : > { %p270_p2 = scmp.lt.s32.totalorder %s1546_s26, 3  ;;  %s234_s28 = scalar_lea.sflag [#allocation3], %s233_s13 }
  0x1a   : > { %1326 = dma.hbm_to_vmem [thread:$0]  (!%p1324_p0), %s245_s27, 128, %s247_s20, %s234_s28  }
  0x1b   : > { %p271_p3 = pnand %p1211_p1, %p270_p2  ;;  %s261_s29 = scalar_lea.hbm %s1930_s1, %s1208_s15 }
  0x1c   : > { %s257_s25 = scalar_lea.vmem [#allocation5], %s1207_s14  ;;  %s263_s16 = sshll.u32 %s261_s29, 4  ;;  %s264_s16 = int_to_ptr.hbm [resolvable:$true] %s263_s16 }
  0x1d   : > { %s265_s11 = sshll.u32 %s257_s25, 4  ;;  %s254_s17 = scalar_lea.sflag [#allocation6], %s233_s13  ;;  %s266_s11 = int_to_ptr.vmem [resolvable:$true] %s265_s11 }
  0x1e   : > { %1329 = dma.hbm_to_vmem [thread:$0]  (!%p1324_p0), %s264_s16, 128, %s266_s11, %s254_s17  }
  0x1f   : > { %274 = sbr.rel (%p271_p3) target bundleno = 1879 (0x757), region = 44  ;;  %s1660_s7 = sand.u32 (!%p271_p3), 1, %s1530_s22  }
  0x20   : > { %s1663_s18 = sshll.u32 (!%p271_p3), %s1660_s7, 3  ;;  %s277_s19 = scalar_lea.sflag (!%p271_p3), [#allocation3], %s1660_s7 }
  0x21   : > { %s280_s20 = scalar_lea.vmem (!%p271_p3), [#allocation2], %s1663_s18 }
  0x24   : > { %1513 = dma.done.wait (%p1630_p8), %s277_s19, 128  }
  0x25   : > { %1515 = vsyncadd (%p1630_p8), %s277_s19, 4294967168  ;;  %s287_s25 = scalar_lea.sflag [#allocation6], %s1660_s7  ;;  %s290_s29 = scalar_lea.vmem [#allocation5], %s1663_s18 }
  0x26   : > { %1517 = dma.done.wait (%p1630_p8), %s287_s25, 128  }
  0x27   : > { %1519 = vsyncadd (%p1630_p8), %s287_s25, 4294967168  ;;  %vm337_vm0 = vcmask 261120   ;;  %v330_v0 = vld [vmem:[%s1932_s3 + $0x8] sm:$0xff]  ;;  %v329_v2 = vld [vmem:[%s1932_s3] sm:$0xff]  ;;  %vm422_vm1 = vcmask 130048   ;;  %vm449_vm2 = vcmask 64512  }
  0x28   : > { %1218 = vmatpush.xpose.msk.msra.mxu2 %vm337_vm0, %v330_v0  ;;  %v328_v1 = vld [vmem:[%s1931_s2 + $0x8] sm:$0xff]  ;;  %v327_v3 = vld [vmem:[%s1931_s2] sm:$0xff]  ;;  %v1692_v4 = vld [vmem:[%s290_s29] sm:$0xff]  ;;  %s1314_s28 = sshll.u32 %s1538_s24, 3  ;;  %s324_s16 = scalar_lea.vmem [#allocation7], %s1663_s18 }
  0x29   : > { %1215 = vmatpush.xpose.msk.msra.mxu0 %vm337_vm0, %v328_v1  ;;  %v1695_v5 = vld [vmem:[%s280_s20] sm:$0xff]  ;;  %v1230_v12 = vld [vmem:[%s1932_s3 + $0x18] sm:$0xff]  ;;  %v1229_v14 = vld [vmem:[%s1932_s3 + $0x10] sm:$0xff]  ;;  %s1095_s8 = scalar_lea.hbm %s1935_s6, %s1314_s28  ;;  %s1097_s17 = sshll.u32 %s324_s16, 4  ;;  %s1098_s17 = int_to_ptr.vmem [resolvable:$true] %s1097_s17 }
  0x2a   : > { %v332_v8 = vld [vmem:[%s1933_s4 + $0x8] sm:$0xff]  ;;  %v331_v9 = vld [vmem:[%s1933_s4] sm:$0xff]  ;;  %v1228_v13 = vld [vmem:[%s1931_s2 + $0x18] sm:$0xff]  ;;  %1240 = vmatpush.xpose.msk.msra.mxu1 %vm337_vm0, %v1230_v12  ;;  %s1099_s19 = sshll.u32 %s1095_s8, 4  ;;  %s1084_s20 = scalar_lea.sflag [#allocation4], %s1660_s7  ;;  %s1100_s19 = int_to_ptr.hbm [resolvable:$true] %s1099_s19 }
  0x2b   : > { %v1227_v15 = vld [vmem:[%s1931_s2 + $0x10] sm:$0xff]  ;;  %v1232_v23 = vld [vmem:[%s1933_s4 + $0x18] sm:$0xff]  ;;  %v334_v27 = vld [vmem:[%s1934_s5 + $0x8] sm:$0xff]  ;;  %s1474_s25 = sshra.s32 %s1100_s19, 4  ;;  %s1480_s18 = scalar_lea.hbm %s1935_s6, 16  ;;  %s1475_s25 = int_to_ptr.hbm [resolvable:$true] %s1474_s25 }
  0x2c   : > { %1219 = vmatpush.xpose.msk.msra.mxu2 %vm337_vm0, %v329_v2  ;;  %v1231_v24 = vld [vmem:[%s1933_s4 + $0x10] sm:$0xff]  ;;  %v336_v25 = vld [vmem:[%s1934_s5 + $0x18] sm:$0xff]  ;;  %v333_v29 = vld [vmem:[%s1934_s5] sm:$0xff]  ;;  %s1476_s24 = scalar_lea.hbm %s1475_s25, 8  ;;  %p1481_p7 = scmp.lt.s32.totalorder %s1475_s25, %s1935_s6 }
  0x2d   : > { %1216 = vmatpush.xpose.msk.msra.mxu0 %vm337_vm0, %v327_v3  ;;  %v335_v26 = vld [vmem:[%s1934_s5 + $0x10] sm:$0xff]  ;;  %v1260_v42 = vld [vmem:[%s1931_s2 + $0x28] sm:$0xff]  ;;  %v1259_v44 = vld [vmem:[%s1931_s2 + $0x20] sm:$0xff]  ;;  %p1477_p4 = scmp.ne.s32.totalorder %s1475_s25, %s1476_s24  ;;  %p1482_p8 = scmp.lt.s32.totalorder %s1480_s18, %s1476_s24 }
  0x2e   : > { %1241 = vmatpush.xpose.msk.msra.mxu1 %vm337_vm0, %v1229_v14  ;;  %v1262_v43 = vld [vmem:[%s1932_s3 + $0x28] sm:$0xff]  ;;  %v1261_v45 = vld [vmem:[%s1932_s3 + $0x20] sm:$0xff]  ;;  %v1236_v46 = vld [vmem:[%s1934_s5 + $0x38] sm:$0xff] }
  0x2f   : > { %1220 = vmatmul.msk.f32.vlgmr.msra.gmra.mxu2 %vm337_vm0, %v1692_v4  ;;  %v1235_v47 = vld [vmem:[%s1934_s5 + $0x30] sm:$0xff]  ;;  %v1234_v48 = vld [vmem:[%s1934_s5 + $0x28] sm:$0xff]  ;;  %v1233_v49 = vld [vmem:[%s1934_s5 + $0x20] sm:$0xff]  ;;  %p1478_p5 = pnand %p1477_p4, %p1634_p9  ;;  %p1483_p10 = por %p1482_p8, %p1481_p7 }
  0x30   : > { %1217 = vmatmul.msk.f32.vlgmr.msra.gmra.mxu0 %vm337_vm0, %v1695_v5  ;;  %1221 = vmatpush.xpose.msk.msrb.mxu2 %vm337_vm0, %v332_v8  ;;  %v1264_v53 = vld [vmem:[%s1933_s4 + $0x28] sm:$0xff]  ;;  %v1263_v54 = vld [vmem:[%s1933_s4 + $0x20] sm:$0xff]  ;;  %v1287_v55 = vld [vmem:[%s1931_s2 + $0x38] sm:$0xff] }
  0x31   : > { %1237 = vmatpush.xpose.msk.msrb.mxu0 %vm337_vm0, %v1228_v13  ;;  %1242 = vmatmul.msk.f32.vlgmr.msra.gmra.mxu1 %vm337_vm0, %v1692_v4  ;;  %v1286_v56 = vld [vmem:[%s1931_s2 + $0x30] sm:$0xff]  ;;  %v1289_v58 = vld [vmem:[%s1932_s3 + $0x38] sm:$0xff]  ;;  %p1479_p6 = pneg %p1478_p5 }
  0x32   : > { %1249 = vmatpush.xpose.msk.msrb.mxu1 %vm422_vm1, %v1236_v46  ;;  %v1288_v61 = vld [vmem:[%s1932_s3 + $0x30] sm:$0xff]  ;;  %v1268_v13 = vld [vmem:[%s1934_s5 + $0x58] sm:$0xff] }
  0x33   : > { %v1290_v12 = vld [vmem:[%s1933_s4 + $0x30] sm:$0xff]  ;;  %p1484_p13 = pnand %p1483_p10, %p1479_p6 }
  0x34   : > { %1222 = vmatpush.xpose.msk.msrb.mxu2 %vm337_vm0, %v331_v9  ;;  %v1267_v14 = vld [vmem:[%s1934_s5 + $0x50] sm:$0xff] }
  0x35   : > { %1238 = vmatpush.xpose.msk.msrb.mxu0 %vm337_vm0, %v1227_v15 }
  0x36   : > { %1250 = vmatpush.xpose.msk.msrb.mxu1 %vm422_vm1, %v1235_v47 }
  0x37   : > { %1223 = vmatmul.msk.f32.vlgmr.msrb.gmra.mxu2 %vm337_vm0, %v1692_v4 }
  0x38   : > { %1239 = vmatmul.msk.f32.vlgmr.msrb.gmra.mxu0 %vm337_vm0, %v1695_v5  ;;  %1243 = vmatpush.xpose.msk.msra.mxu2 %vm337_vm0, %v1232_v23 }
  0x3a   : > { %1251 = vmatpush.xpose.msk.msrb.mxu1 %vm422_vm1, %v1234_v48 }
  0x3c   : > { %1244 = vmatpush.xpose.msk.msra.mxu2 %vm337_vm0, %v1231_v24 }
  0x3e   : > { %1252 = vmatpush.xpose.msk.msrb.mxu1 %vm422_vm1, %v1233_v49 }
  0x3f   : > { %1245 = vmatmul.msk.f32.vlgmr.msra.gmra.mxu2 %vm337_vm0, %v1692_v4 }
  0x40   : > { %1254 = vmatpush.xpose.msk.msrb.mxu2 %vm422_vm1, %v336_v25  ;;  %v1295_v25 = vld [vmem:[%s1934_s5 + $0x78] sm:$0xff] }
  0x44   : > { %1255 = vmatpush.xpose.msk.msrb.mxu2 %vm422_vm1, %v335_v26 }
  0x48   : > { %1256 = vmatpush.xpose.msk.msrb.mxu2 %vm422_vm1, %v334_v27 }
  0x4c   : > { %1257 = vmatpush.xpose.msk.msrb.mxu2 %vm422_vm1, %v333_v29 }
  0x50   : > { %1281 = vmatpush.xpose.msk.msra.mxu2 %vm422_vm1, %v1268_v13 }
  0x54   : > { %1282 = vmatpush.xpose.msk.msra.mxu2 %vm422_vm1, %v1267_v14 }
  0xad   : > { %v364_v7 = vpop.f32.mrf.mxu0 }
  0xae   : > { %v547_v22 = vpop.f32.mrf.mxu1 }
  0xb2   : > { %v393_v6 = vpop.f32.mrf.mxu2 }
  0xb3   : > { %1224 = vmatpush.xpose.msk.msra.mxu3 %vm422_vm1, %v393_v6 }
  0xb5   : > { %v521_v32 = vpop.f32.mrf.mxu0 }
  0xb6   : > { %1225 = vmatmul.msk.f32.vlgmr.msra.gmra.mxu3 %vm422_vm1, %v364_v7 }
  0xba   : > { %v419_v21 = vpop.f32.mrf.mxu2 }
  0xbb   : > { %479 = vmatpush.msrb.mxu3 %v419_v21 }
  0xbd   : > { %1246 = vmatpush.xpose.msk.msra.mxu3 %vm422_vm1, %v547_v22 }
  0xc2   : > { %v573_v33 = vpop.f32.mrf.mxu2 }
  0xc3   : > { %631 = vmatpush.msra.mxu0 %v573_v33  ;;  %v1292_v33 = vld [vmem:[%s1934_s5 + $0x60] sm:$0xff] }
  0xc5   : > { %1272 = vmatpush.xpose.msk.msrb.mxu0 %vm337_vm0, %v1262_v43 }
  0xc9   : > { %1273 = vmatpush.xpose.msk.msrb.mxu0 %vm337_vm0, %v1261_v45 }
 0x139   : > { %v446_v10 = vpop.f32.mrf.mxu3 }
 0x13a   : > { %v450_v11 = vsel %vm449_vm2, %v446_v10, -inf }
 0x13b   : > { %451 = vmax.xlane.f32.xlu0 %v450_v11  ;;  %v1291_v11 = vld [vmem:[%s1933_s4 + $0x38] sm:$0xff] }
 0x1ae   : > { %v452_v16 = vpop.xlane.xlu0 %451 }
 0x1af   : > { %v453_v17 = vsub.f32 %v446_v10, %v452_v16  ;;  %v1266_v16 = vld [vmem:[%s1934_s5 + $0x48] sm:$0xff] }
 0x1b0   : > { %1283 = vmatpush.xpose.msk.msra.mxu2 %vm422_vm1, %v1266_v16 }
 0x1b1   : > { %v454_v18 = vmul.f32 1.442695, %v453_v17  ;;  %v1265_v17 = vld [vmem:[%s1934_s5 + $0x40] sm:$0xff] }
 0x1b3   : > { %1384 = vpow2.f32 %v454_v18 }
 0x1b4   : > { %1284 = vmatpush.xpose.msk.msra.mxu2 %vm422_vm1, %v1265_v17 }
 0x1b9   : > { %v1385_v19 = vpop.eup %1384 }
 0x1ba   : > { %v456_v20 = vsel %vm449_vm2, %v1385_v19, 0.0 }
 0x1bb   : > { %457 = vadd.xlane.f32.xlu0 %v456_v20 }
 0x22e   : > { %v458_v28 = vpop.xlane.xlu0 %457 }
 0x22f   : > { %1386 = vrcp.f32 %v458_v28 }
 0x235   : > { %v1387_v30 = vpop.eup %1386 }
 0x236   : > { %v460_v31 = vmul.f32 %v1387_v30, %v1385_v19 }
 0x238   : > { %1226 = vmatmul.msk.f32.vlgmr.msrb.gmra.mxu3 %vm449_vm2, %v460_v31  ;;  %v1294_v31 = vld [vmem:[%s1934_s5 + $0x70] sm:$0xff] }
 0x239   : > { %1269 = vmatpush.xpose.msk.msrb.mxu3 %vm337_vm0, %v1260_v42 }
 0x23d   : > { %1270 = vmatpush.xpose.msk.msrb.mxu3 %vm337_vm0, %v1259_v44 }
 0x240   : > { %1247 = vmatmul.msk.f32.vlgmr.msra.gmra.mxu3 %vm422_vm1, %v521_v32  ;;  %v1293_v32 = vld [vmem:[%s1934_s5 + $0x68] sm:$0xff] }
 0x241   : > { %1275 = vmatpush.xpose.msk.msra.mxu3 %vm337_vm0, %v1264_v53 }
 0x245   : > { %1276 = vmatpush.xpose.msk.msra.mxu3 %vm337_vm0, %v1263_v54 }
 0x248   : > { %1271 = vmatmul.msk.f32.vlgmr.msrb.gmra.mxu3 %vm337_vm0, %v1695_v5 }
 0x249   : > { %1296 = vmatpush.xpose.msk.msrb.mxu3 %vm337_vm0, %v1287_v55 }
 0x24d   : > { %1297 = vmatpush.xpose.msk.msrb.mxu3 %vm337_vm0, %v1286_v56 }
 0x250   : > { %1277 = vmatmul.msk.f32.vlgmr.msra.gmra.mxu3 %vm337_vm0, %v1692_v4 }
 0x258   : > { %1298 = vmatmul.msk.f32.vlgmr.msrb.gmra.mxu3 %vm337_vm0, %v1695_v5 }
 0x2bb   : > { %v481_v34 = vpop.f32.mrf.mxu3 }
 0x2bc   : > { %1258 = vmatmul.msk.f32.vlgmr.msrb.gmra.mxu2 %vm422_vm1, %v481_v34 }
 0x2c3   : > { %v599_v35 = vpop.f32.mrf.mxu3 }
 0x2c4   : > { %v602_v36 = vsel %vm449_vm2, %v599_v35, -inf }
 0x2c5   : > { %603 = vmax.xlane.f32.xlu1 %v602_v36 }
 0x2cb   : > { %v743_v60 = vpop.f32.mrf.mxu3 }
 0x2d3   : > { %v795_v62 = vpop.f32.mrf.mxu3 }
 0x2d4   : > { %853 = vmatpush.msra.mxu1 %v795_v62 }
 0x2db   : > { %v931_v2 = vpop.f32.mrf.mxu3 }
 0x338   : > { %v604_v37 = vpop.xlane.xlu1 %603 }
 0x339   : > { %v605_v38 = vsub.f32 %v599_v35, %v604_v37 }
 0x33b   : > { %v606_v39 = vmul.f32 1.442695, %v605_v38 }
 0x33d   : > { %1388 = vpow2.f32 %v606_v39 }
 0x33f   : > { %v703_v35 = vpop.f32.mrf.mxu2 }
 0x343   : > { %v1389_v40 = vpop.eup %1388 }
 0x344   : > { %v608_v41 = vsel %vm449_vm2, %v1389_v40, 0.0 }
 0x345   : > { %609 = vadd.xlane.f32.xlu1 %v608_v41 }
 0x3b8   : > { %v610_v50 = vpop.xlane.xlu1 %609 }
 0x3b9   : > { %1390 = vrcp.f32 %v610_v50 }
 0x3bf   : > { %v1391_v51 = vpop.eup %1390 }
 0x3c0   : > { %v612_v52 = vmul.f32 %v1391_v51, %v1389_v40 }
 0x3c2   : > { %1248 = vmatmul.msk.f32.vlgmr.msra.gmra.mxu0 %vm449_vm2, %v612_v52 }
 0x3ca   : > { %1274 = vmatmul.msk.f32.vlgmr.msrb.gmra.mxu0 %vm337_vm0, %v1692_v4 }
 0x43f   : > { %v633_v57 = vpop.f32.mrf.mxu0 }
 0x440   : > { %1253 = vmatmul.msk.f32.vlgmr.msrb.gmra.mxu1 %vm422_vm1, %v633_v57 }
 0x441   : > { %1302 = vmatpush.xpose.msk.msrb.mxu1 %vm337_vm0, %v1291_v11 }
 0x445   : > { %1303 = vmatpush.xpose.msk.msrb.mxu1 %vm337_vm0, %v1290_v12 }
 0x447   : > { %v769_v59 = vpop.f32.mrf.mxu0 }
 0x448   : > { %1278 = vmatpush.xpose.msk.msra.mxu0 %vm422_vm1, %v769_v59 }
 0x44b   : > { %1279 = vmatmul.msk.f32.vlgmr.msra.gmra.mxu0 %vm422_vm1, %v743_v60 }
 0x44c   : > { %1299 = vmatpush.xpose.msk.msrb.mxu0 %vm337_vm0, %v1289_v58 }
 0x450   : > { %1300 = vmatpush.xpose.msk.msrb.mxu0 %vm337_vm0, %v1288_v61 }
 0x453   : > { %1301 = vmatmul.msk.f32.vlgmr.msrb.gmra.mxu0 %vm337_vm0, %v1692_v4 }
 0x4bd   : > { %v668_v26 = vpop.f32.mrf.mxu1 }
 0x4be   : > { %v704_v37 = vadd.f32 %v703_v35, %v668_v26 }
 0x4c8   : > { %v821_v63 = vpop.f32.mrf.mxu0 }
 0x4c9   : > { %v824_v0 = vsel %vm449_vm2, %v821_v63, -inf }
 0x4ca   : > { %825 = vmax.xlane.f32.xlu2 %v824_v0 }
 0x4d0   : > { %v957_v1 = vpop.f32.mrf.mxu0 }
 0x4d1   : > { %1305 = vmatpush.xpose.msk.msra.mxu3 %vm422_vm1, %v957_v1 }
 0x4d4   : > { %1306 = vmatmul.msk.f32.vlgmr.msra.gmra.mxu3 %vm422_vm1, %v931_v2 }
 0x53d   : > { %v826_v3 = vpop.xlane.xlu2 %825 }
 0x53e   : > { %v827_v5 = vsub.f32 %v821_v63, %v826_v3 }
 0x540   : > { %v828_v6 = vmul.f32 1.442695, %v827_v5 }
 0x542   : > { %1392 = vpow2.f32 %v828_v6 }
 0x548   : > { %v1393_v7 = vpop.eup %1392 }
 0x549   : > { %v830_v8 = vsel %vm449_vm2, %v1393_v7, 0.0 }
 0x54a   : > { %831 = vadd.xlane.f32.xlu2 %v830_v8 }
 0x557   : > { %v1009_v9 = vpop.f32.mrf.mxu3 }
 0x558   : > { %v1012_v10 = vsel %vm449_vm2, %v1009_v9, -inf }
 0x559   : > { %1013 = vmax.xlane.f32.xlu0 %v1012_v10 }
 0x5bd   : > { %v832_v15 = vpop.xlane.xlu2 %831 }
 0x5be   : > { %1394 = vrcp.f32 %v832_v15 }
 0x5c4   : > { %v1395_v18 = vpop.eup %1394 }
 0x5c5   : > { %v834_v19 = vmul.f32 %v1395_v18, %v1393_v7 }
 0x5c7   : > { %1280 = vmatmul.msk.f32.vlgmr.msra.gmra.mxu1 %vm449_vm2, %v834_v19 }
 0x5c8   : > { %1308 = vmatpush.xpose.msk.msra.mxu1 %vm422_vm1, %v1295_v25 }
 0x5cc   : > { %v1014_v20 = vpop.xlane.xlu0 %1013  ;;  %1309 = vmatpush.xpose.msk.msra.mxu1 %vm422_vm1, %v1294_v31 }
 0x5cd   : > { %v1015_v21 = vsub.f32 %v1009_v9, %v1014_v20 }
 0x5cf   : > { %v1016_v22 = vmul.f32 1.442695, %v1015_v21  ;;  %1304 = vmatmul.msk.f32.vlgmr.msrb.gmra.mxu1 %vm337_vm0, %v1692_v4 }
 0x5d0   : > { %1310 = vmatpush.xpose.msk.msra.mxu1 %vm422_vm1, %v1293_v32 }
 0x5d1   : > { %1396 = vpow2.f32 %v1016_v22 }
 0x5d4   : > { %1311 = vmatpush.xpose.msk.msra.mxu1 %vm422_vm1, %v1292_v33 }
 0x5d7   : > { %v1397_v23 = vpop.eup %1396 }
 0x5d8   : > { %v1018_v24 = vsel %vm449_vm2, %v1397_v23, 0.0 }
 0x5d9   : > { %1019 = vadd.xlane.f32.xlu1 %v1018_v24 }
 0x644   : > { %v855_v27 = vpop.f32.mrf.mxu1 }
 0x645   : > { %1285 = vmatmul.msk.f32.vlgmr.msra.gmra.mxu2 %vm422_vm1, %v855_v27 }
 0x64c   : > { %v1020_v28 = vpop.xlane.xlu1 %1019  ;;  %v983_v29 = vpop.f32.mrf.mxu1 }
 0x64d   : > { %1398 = vrcp.f32 %v1020_v28  ;;  %1041 = vmatpush.msra.mxu0 %v983_v29 }
 0x653   : > { %v1399_v4 = vpop.eup %1398 }
 0x654   : > { %v1022_v30 = vmul.f32 %v1399_v4, %v1397_v23 }
 0x656   : > { %1307 = vmatmul.msk.f32.vlgmr.msra.gmra.mxu0 %vm449_vm2, %v1022_v30 }
 0x6c8   : > { %v890_v36 = vpop.f32.mrf.mxu2 }
 0x6c9   : > { %v893_v38 = vadd.f32 %v890_v36, %v704_v37 }
 0x6d3   : > { %v1043_v34 = vpop.f32.mrf.mxu0 }
 0x6d4   : > { %1312 = vmatmul.msk.f32.vlgmr.msra.gmra.mxu1 %vm422_vm1, %v1043_v34 }
 0x751   : > { %v1078_v39 = vpop.f32.mrf.mxu1 }
 0x752   : > { %v1081_v40 = vadd.f32 %v1078_v39, %v893_v38 }
 0x754   : > { %1082 = vst.msk [vmem:[%s324_s16] sm:$0xff] %vm337_vm0, %v1081_v40 }
 0x755   : > { %1487 = shalt.err (!%p1484_p13)
}
 0x756   : > { %1321 = dma.vmem_to_hbm [thread:$0]  (%p1634_p9), %s1098_s17, 128, %s1100_s19, %s1084_s20  }
 0x757 PF: > { %s1111_s7 = sand.u32 1, %s1526_s21   ;;  %p1331_p0 = pnand %p1206_p12, %p1641_p11 }
 0x758   : > { %s1112_s15 = scalar_lea.sflag [#allocation4], %s1111_s7 }
 0x759   : > { %p1332_p1 = pneg %p1331_p0 }
 0x75b   : > { %1521 = dma.done.wait (%p1332_p1), %s1112_s15, 128  }
 0x75c   : > { %1523 = vsyncadd (%p1332_p1), %s1112_s15, 4294967168  ;;  %s25_s26 = sadd.s32 1, %s1546_s26   ;;  %s1945_s27 = sld [smem:[#allocation13_spill]] }
 0x75d   : > { %p22_p2 = scmp.ge.s32.totalorder %s25_s26, 4   ;;  %s1946_s24 = sld [smem:[#allocation11_spill]] }
 0x75e   : > { %s1947_s25 = sld [smem:[#allocation12_spill]]  ;;  %s1948_s21 = smov %s1530_s22 }
 0x75f   : > { %s1949_s22 = smov %s1534_s23  ;;  %24 = sbr.rel (!%p22_p2) target bundleno = 8 (0x8), region = 114 }
 0x762   : > { %s1950_s23 = smov %s1945_s27 }
 0x764   :  { %1118 = vsyncpa [#allocation3], 1 }
 0x765   :  { %1120 = vsyncpa [#allocation3 + $0x1], 1 }
 0x766   :  { %1121 = vsyncpa [#allocation6], 1 }
 0x767   :  { %1123 = vsyncpa [#allocation6 + $0x1], 1 }
 0x768   :  { %1124 = vsyncpa [#allocation4], 1 }
 0x769   :  { %1126 = vsyncpa [#allocation4 + $0x1], 1 }

</bundles_post_ra>
